<compile_context>
chip_gen: v7x
topology: tpu7x:2x2x1
jax: 0.10.0
libtpu: 0.0.40
codegen_flags: <defaults>
</compile_context>

<pallas_src>
import functools

import jax
import jax.numpy as jnp
import numpy as np
from jax.experimental import pallas as pl
from jax.experimental.pallas import tpu as pltpu


def hinton_ce_kernel(x_ref, w_ref, b_ref, y_pred_ref, labels_ref, out_ref,
                     acc_ref, *, ratio, temperature, batch, tm, num_classes):
    i = pl.program_id(0)
    k = pl.program_id(1)

    # ---- teacher forward (no_grad), streamed over D: acc += x_blk @ W_blk ----
    # bf16 operands on the MXU (cast once in the wrapper), f32 accumulation.
    @pl.when(k == 0)
    def _():
        acc_ref[...] = jnp.zeros_like(acc_ref)

    acc_ref[...] += jnp.dot(x_ref[...], w_ref[...],
                            preferred_element_type=jnp.float32)

    # ---- fused softmax statistics + CE epilogue, once per batch tile ---------
    @pl.when(k == pl.num_programs(1) - 1)
    def _():
        teacher_logits = acc_ref[...] + b_ref[...]             # (TM, C_pad) f32
        y_pred = y_pred_ref[...]                               # (TM, C_pad) f32
        TM, C_pad = y_pred.shape
        labels = labels_ref[...]                               # (TM, 1) int32
        cols = jax.lax.broadcasted_iota(jnp.int32, (TM, C_pad), 1)

        if num_classes != C_pad:  # static: skip masks when C already lane-aligned
            neg = jnp.float32(-1e30)                           # finite: no inf*0 NaNs
            col_valid = cols < num_classes
            y_pred = jnp.where(col_valid, y_pred, neg)
            teacher_logits = jnp.where(col_valid, teacher_logits, neg)

        # hard CE: -(y_pred[label] - m - log s); no one-hot / log-softmax tiles
        m_h = jnp.max(y_pred, axis=-1, keepdims=True)
        diff = y_pred - m_h
        s_h = jnp.sum(jnp.exp(diff), axis=-1, keepdims=True)
        picked = jnp.sum(jnp.where(cols == labels, y_pred, 0.0),
                         axis=-1, keepdims=True)
        cnt = jnp.logical_and(labels >= 0, labels < num_classes).astype(jnp.float32)
        raw_hard = cnt * (m_h + jnp.log(s_h)) - picked         # (TM, 1)

        # soft CE with tempered softmaxes; student shares m_h / diff with hard CE
        inv_t = jnp.float32(1.0 / temperature)
        if temperature == 1.0:        # static fast path: reuse hard-CE stats
            shifted_s = diff
            log_s_s = jnp.log(s_h)
        else:                          # m_s == m_h * inv_t
            shifted_s = diff * inv_t
            log_s_s = jnp.log(jnp.sum(jnp.exp(shifted_s), axis=-1, keepdims=True))

        m_t = jnp.max(teacher_logits, axis=-1, keepdims=True)
        e_t = jnp.exp((teacher_logits - m_t) * inv_t)
        s_t = jnp.sum(e_t, axis=-1, keepdims=True)
        # -sum(p_t * (shifted_s - log s_s)) with p_t = e_t / s_t; no p_teacher
        # tile is materialized, the reciprocal only touches a (TM, 1) vector.
        dot_ts = jnp.sum(e_t * shifted_s, axis=-1, keepdims=True)
        raw_soft = log_s_s - dot_ts * pl.reciprocal(s_t, approx=True)

        raw = raw_hard + jnp.float32(ratio) * raw_soft         # (TM, 1)

        # mask padded batch rows (last partial tile)
        row_ids = i * tm + jax.lax.broadcasted_iota(jnp.int32, (TM, 1), 0)
        raw = jnp.where(row_ids < batch, raw, 0.0)

        # per-tile partial sum, written lane-dense (unmasked vst)
        out_ref[...] = jnp.zeros(out_ref.shape, jnp.float32) + jnp.sum(raw)


def _vmem_budget():
    phys = 64 * 1024 * 1024                    # conservative: v7x per-TC VMEM
    try:
        phys = int(pltpu.get_tpu_info().vmem_capacity_bytes)
    except Exception:                          # CPU tracing / older runtimes
        pass
    # ~16 MiB headroom for compiler-internal scratch; cap at 112 MiB on the
    # 128 MiB parts (v5e/v6e) so double-buffered DMAs never hit the wall.
    limit = int(max(32 * 1024 * 1024,
                    min(phys - 16 * 1024 * 1024, 112 * 1024 * 1024)))
    budget = int(limit * 0.6)                  # tiling budget (slack for temps)
    return limit, budget


def _default_tm(batch, tk, c_pad, budget):
    # W blocks (bf16, double-buffered) + bias are tile-size independent.
    fixed = 2 * (tk * c_pad * 2) + 2 * (c_pad * 4)
    per_row = (2 * tk * 2            # x tile, bf16, double-buffered
               + 2 * c_pad * 4       # y_pred tile, f32, double-buffered
               + c_pad * 4           # teacher-logit f32 accumulator scratch
               + 6 * c_pad * 4       # live (TM, C_pad) f32 epilogue temporaries
               + 16)                 # labels & (TM, 1) vectors
    tm = (budget - fixed) // max(per_row, 1)
    tm = max(8, min(1024, (tm // 8) * 8))
    return int(min(tm, pl.cdiv(batch, 8) * 8))


def hinton_cross_entropy_loss(x, teacher_w, teacher_b, y_pred, y,
                              ratio=1.0, temperature=1.0, reduction='mean',
                              tm=None, tk=None):
    """HintonCrossEntropyLoss forward; teacher = Linear(D, C)."""
    assert reduction in ('mean', 'sum')
    # TODO(synk): reduction='none' (per-sample (B,) output) not wired up.

    x = jnp.asarray(x, jnp.float32)
    w = jnp.asarray(teacher_w, jnp.float32)                    # (C, D)
    bias = jnp.asarray(teacher_b, jnp.float32)
    y_pred = jnp.asarray(y_pred, jnp.float32)
    labels = jnp.asarray(y, jnp.int32)

    B, D = x.shape
    C = y_pred.shape[-1]

    # --- one-time wrapper-side layout/dtype prep (fused by XLA) ---------------
    # W^T so the kernel runs the canonical (TM,TK)@(TK,C_pad) MXU matmul.
    w_t = w.T                                                  # (D, C)

    c_pad = pl.cdiv(C, 128) * 128
    if c_pad != C:
        w_t = jnp.pad(w_t, ((0, 0), (0, c_pad - C)))
        bias = jnp.pad(bias, ((0, c_pad - C),))
        y_pred = jnp.pad(y_pred, ((0, 0), (0, c_pad - C)))

    # --- D streaming (reduction grid axis) ------------------------------------
    if tk is None:
        tk = D if D <= 512 else 512
    tk = int(tk)
    if tk >= D:
        tk, d_pad = D, D
    else:
        assert tk % 128 == 0, "tk must be a multiple of 128 when tk < D"
        d_pad = pl.cdiv(D, tk) * tk
    if d_pad != D:
        x = jnp.pad(x, ((0, 0), (0, d_pad - D)))
        w_t = jnp.pad(w_t, ((0, d_pad - D), (0, 0)))
    num_k = d_pad // tk

    x_bf = x.astype(jnp.bfloat16)                              # halve x stream
    w_bf = w_t.astype(jnp.bfloat16)                            # halve W stream

    # --- batch tiling ----------------------------------------------------------
    vmem_limit, vmem_budget = _vmem_budget()
    if tm is None:
        tm = _default_tm(B, tk, c_pad, vmem_budget)
    tm = max(8, (int(tm) // 8) * 8)
    b_pad = pl.cdiv(B, tm) * tm
    if b_pad != B:
        x_bf = jnp.pad(x_bf, ((0, b_pad - B), (0, 0)))
        y_pred = jnp.pad(y_pred, ((0, b_pad - B), (0, 0)))
        labels = jnp.pad(labels, ((0, b_pad - B),), constant_values=-1)
    num_tiles = b_pad // tm

    bias2d = bias.reshape(1, c_pad)
    labels2d = labels.reshape(b_pad, 1)

    kernel = functools.partial(
        hinton_ce_kernel,
        ratio=float(ratio), temperature=float(temperature),
        batch=B, tm=tm, num_classes=C)

    partials = pl.pallas_call(
        kernel,
        out_shape=jax.ShapeDtypeStruct((num_tiles, 8, 128), jnp.float32),
        grid=(num_tiles, num_k),
        in_specs=[
            pl.BlockSpec((tm, tk), lambda i, k: (i, k)),       # x tile (bf16)
            pl.BlockSpec((tk, c_pad), lambda i, k: (k, 0)),    # W^T block (bf16)
            pl.BlockSpec((1, c_pad), lambda i, k: (0, 0)),     # bias (f32)
            pl.BlockSpec((tm, c_pad), lambda i, k: (i, 0)),    # student logits
            pl.BlockSpec((tm, 1), lambda i, k: (i, 0)),        # labels
        ],
        out_specs=pl.BlockSpec((1, 8, 128), lambda i, k: (i, 0, 0)),
        scratch_shapes=[pltpu.VMEM((tm, c_pad), jnp.float32)],
        compiler_params=pltpu.CompilerParams(
            dimension_semantics=("parallel", "arbitrary"),     # batch megacore-able
            vmem_limit_bytes=vmem_limit),
    )(x_bf, w_bf, bias2d, y_pred, labels2d)

    # tiny final reduction outside the kernel
    total = jnp.sum(partials[:, 0, 0])
    if reduction == 'mean':
        return total / B
    return total


def _reference(x, w, b, y_pred, y, ratio, temperature, reduction='mean'):
    logits_t = x @ w.T + b
    p_student = jax.nn.softmax(y_pred, axis=-1)
    p_student_t = jax.nn.softmax(y_pred / temperature, axis=-1)
    p_teacher_t = jax.nn.softmax(logits_t / temperature, axis=-1)
    onehot = jax.nn.one_hot(y, y_pred.shape[-1], dtype=jnp.float32)
    hard = -(onehot * jnp.log(p_student)).sum(-1)
    soft = -(p_teacher_t * jnp.log(p_student_t)).sum(-1)
    raw = hard + ratio * soft
    return raw.mean() if reduction == 'mean' else raw.sum()


if __name__ == "__main__":
    key = jax.random.PRNGKey(0)
    (k_x, k_w, k_b, k_p, k_y,
     k_x2, k_w2, k_b2, k_p2, k_y2) = jax.random.split(key, 10)

    # --- case 1: B=20, D=32, C=10; multi batch tile (tm=8), T != 1 -------------
    B, D, C = 20, 32, 10
    x = jax.random.normal(k_x, (B, D), dtype=jnp.float32)
    teacher_w = jax.random.normal(k_w, (C, D), dtype=jnp.float32) * 0.1
    teacher_b = jax.random.normal(k_b, (C,), dtype=jnp.float32) * 0.1
    y_pred = jax.random.normal(k_p, (B, C), dtype=jnp.float32)
    y = jax.random.randint(k_y, (B,), 0, C, dtype=jnp.int32)

    ref1 = _reference(x, teacher_w, teacher_b, y_pred, y, 0.7, 2.0)
    out1 = hinton_cross_entropy_loss(x, teacher_w, teacher_b, y_pred, y,
                                     ratio=0.7, temperature=2.0, tm=8)

    # T == 1 static fast path, auto tile size
    ref2 = _reference(x, teacher_w, teacher_b, y_pred, y, 0.5, 1.0)
    out2 = hinton_cross_entropy_loss(x, teacher_w, teacher_b, y_pred, y,
                                     ratio=0.5, temperature=1.0)

    # --- case 2: D streamed over 2 k-steps (tk=128 < D=256), reduction='sum' ---
    B2, D2, C2 = 16, 256, 10
    x2 = jax.random.normal(k_x2, (B2, D2), dtype=jnp.float32)
    teacher_w2 = jax.random.normal(k_w2, (C2, D2), dtype=jnp.float32) * 0.05
    teacher_b2 = jax.random.normal(k_b2, (C2,), dtype=jnp.float32) * 0.1
    y_pred2 = jax.random.normal(k_p2, (B2, C2), dtype=jnp.float32)
    y2 = jax.random.randint(k_y2, (B2,), 0, C2, dtype=jnp.int32)

    ref3 = _reference(x2, teacher_w2, teacher_b2, y_pred2, y2, 1.0, 3.0,
                      reduction='sum')
    out3 = hinton_cross_entropy_loss(x2, teacher_w2, teacher_b2, y_pred2, y2,
                                     ratio=1.0, temperature=3.0,
                                     reduction='sum', tk=128)

    out1, out2, out3 = jax.block_until_ready((out1, out2, out3))

    # tolerance accounts for bf16 teacher matmul + EUP approximate reciprocal
    np.testing.assert_allclose(np.asarray(out1), np.asarray(ref1), rtol=2e-2, atol=2e-2)
    np.testing.assert_allclose(np.asarray(out2), np.asarray(ref2), rtol=2e-2, atol=2e-2)
    np.testing.assert_allclose(np.asarray(out3), np.asarray(ref3), rtol=2e-2, atol=2e-2)

    print("KERNEL_OK")
</pallas_src>

<mosaic_0001>
module attributes {stable_mosaic.version = 11 : i64} {
  func.func @hinton_ce_kernel(%arg0: i32, %arg1: i32, %arg2: memref<8x32xbf16, #tpu.memory_space<vmem>>, %arg3: memref<32x128xbf16, #tpu.memory_space<vmem>>, %arg4: memref<1x128xf32, #tpu.memory_space<vmem>>, %arg5: memref<8x128xf32, #tpu.memory_space<vmem>>, %arg6: memref<8x1xi32, #tpu.memory_space<vmem>>, %arg7: memref<1x8x128xf32, #tpu.memory_space<vmem>>, %arg8: memref<8x128xf32, #tpu.memory_space<vmem>>) attributes {dimension_semantics = [#tpu.dimension_semantics<parallel>, #tpu.dimension_semantics<arbitrary>], iteration_bounds = array<i64: 3, 1>, scalar_prefetch = 0 : i64, scratch_operands = 1 : i64, tpu.core_type = #tpu.core_type<tc>, window_params = [{transform_indices = @transform_0, window_bounds = array<i64: 8, 32>}, {transform_indices = @transform_1, window_bounds = array<i64: 32, 128>}, {pipeline_mode = #tpu.pipeline_mode<synchronous>, transform_indices = @transform_2, window_bounds = array<i64: 1, 128>}, {transform_indices = @transform_3, window_bounds = array<i64: 8, 128>}, {transform_indices = @transform_4, window_bounds = array<i64: 8, 1>}, {transform_indices = @transform_5, window_bounds = array<i64: 1, 8, 128>}]} {
    %c0_i32 = arith.constant 0 : i32
    %0 = arith.cmpi eq, %arg1, %c0_i32 : i32
    %1 = arith.extui %0 : i1 to i32
    %c0_i32_0 = arith.constant 0 : i32
    %2 = arith.cmpi ne, %1, %c0_i32_0 : i32
    scf.if %2 {
      %cst_10 = arith.constant 0.000000e+00 : f32
      %12 = vector.broadcast %cst_10 : f32 to vector<8x128xf32>
      %c0_11 = arith.constant 0 : index
      %c0_12 = arith.constant 0 : index
      %13 = vector.load %arg8[%c0_11, %c0_12] : memref<8x128xf32, #tpu.memory_space<vmem>>, vector<8x128xf32>
      tpu.vector_store %arg8[%c0_11, %c0_12], %12 {strides = array<i32>} : memref<8x128xf32, #tpu.memory_space<vmem>>, vector<8x128xf32>,
    } else {
    }
    %c0 = arith.constant 0 : index
    %c0_1 = arith.constant 0 : index
    %3 = vector.load %arg8[%c0, %c0_1] : memref<8x128xf32, #tpu.memory_space<vmem>>, vector<8x128xf32>
    %c0_2 = arith.constant 0 : index
    %c0_3 = arith.constant 0 : index
    %4 = vector.load %arg2[%c0_2, %c0_3] : memref<8x32xbf16, #tpu.memory_space<vmem>>, vector<8x32xbf16>
    %c0_4 = arith.constant 0 : index
    %c0_5 = arith.constant 0 : index
    %5 = vector.load %arg3[%c0_4, %c0_5] : memref<32x128xbf16, #tpu.memory_space<vmem>>, vector<32x128xbf16>
    %cst = arith.constant dense<0.000000e+00> : vector<8x128xf32>
    %6 = tpu.matmul %4, %5, %cst {dimension_numbers = #tpu.dot_dimension_numbers<[1], [0], [0], [1], [0, 0, 1, 1], [], []>} : vector<8x32xbf16>, vector<32x128xbf16>, vector<8x128xf32> -> vector<8x128xf32>
    %7 = arith.addf %3, %6 : vector<8x128xf32>
    %c0_6 = arith.constant 0 : index
    %c0_7 = arith.constant 0 : index
    %8 = vector.load %arg8[%c0_6, %c0_7] : memref<8x128xf32, #tpu.memory_space<vmem>>, vector<8x128xf32>
    tpu.vector_store %arg8[%c0_6, %c0_7], %7 {strides = array<i32>} : memref<8x128xf32, #tpu.memory_space<vmem>>, vector<8x128xf32>,
    %c0_i32_8 = arith.constant 0 : i32
    %9 = arith.cmpi eq, %arg1, %c0_i32_8 : i32
    %10 = arith.extui %9 : i1 to i32
    %c0_i32_9 = arith.constant 0 : i32
    %11 = arith.cmpi ne, %10, %c0_i32_9 : i32
    scf.if %11 {
      %c0_10 = arith.constant 0 : index
      %c0_11 = arith.constant 0 : index
      %12 = vector.load %arg8[%c0_10, %c0_11] : memref<8x128xf32, #tpu.memory_space<vmem>>, vector<8x128xf32>
      %c0_12 = arith.constant 0 : index
      %c0_13 = arith.constant 0 : index
      %13 = vector.load %arg4[%c0_12, %c0_13] : memref<1x128xf32, #tpu.memory_space<vmem>>, vector<1x128xf32>
      %14 = vector.broadcast %13 : vector<1x128xf32> to vector<8x128xf32>
      %15 = arith.addf %12, %14 : vector<8x128xf32>
      %c0_14 = arith.constant 0 : index
      %c0_15 = arith.constant 0 : index
      %16 = vector.load %arg5[%c0_14, %c0_15] : memref<8x128xf32, #tpu.memory_space<vmem>>, vector<8x128xf32>
      %c0_16 = arith.constant 0 : index
      %c0_17 = arith.constant 0 : index
      %17 = vector.load %arg6[%c0_16, %c0_17] : memref<8x1xi32, #tpu.memory_space<vmem>>, vector<8x1xi32>
      %18 = tpu.iota {dimensions = array<i32: 1>} : vector<8x128xi32>
      %c10_i32 = arith.constant 10 : i32
      %19 = vector.broadcast %c10_i32 : i32 to vector<8x128xi32>
      %20 = arith.cmpi slt, %18, %19 : vector<8x128xi32>
      %cst_18 = arith.constant -1.000000e+30 : f32
      %21 = vector.broadcast %cst_18 : f32 to vector<8x128xf32>
      %22 = arith.select %20, %16, %21 : vector<8x128xi1>, vector<8x128xf32>
      %cst_19 = arith.constant -1.000000e+30 : f32
      %23 = vector.broadcast %cst_19 : f32 to vector<8x128xf32>
      %24 = arith.select %20, %15, %23 : vector<8x128xi1>, vector<8x128xf32>
      %cst_20 = arith.constant dense<0xFF800000> : vector<8xf32>
      %25 = vector.multi_reduction <maximumf>, %22, %cst_20 [1] : vector<8x128xf32> to vector<8xf32>
      %26 = vector.shape_cast %25 : vector<8xf32> to vector<8x1xf32>
      %27 = vector.broadcast %26 : vector<8x1xf32> to vector<8x128xf32>
      %28 = arith.subf %22, %27 : vector<8x128xf32>
      %29 = math.exp %28 : vector<8x128xf32>
      %cst_21 = arith.constant dense<0.000000e+00> : vector<8xf32>
      %30 = vector.multi_reduction <add>, %29, %cst_21 [1] : vector<8x128xf32> to vector<8xf32>
      %31 = vector.shape_cast %30 : vector<8xf32> to vector<8x1xf32>
      %32 = vector.broadcast %17 : vector<8x1xi32> to vector<8x128xi32>
      %33 = arith.cmpi eq, %18, %32 : vector<8x128xi32>
      %cst_22 = arith.constant 0.000000e+00 : f32
      %34 = vector.broadcast %cst_22 : f32 to vector<8x128xf32>
      %35 = arith.select %33, %22, %34 : vector<8x128xi1>, vector<8x128xf32>
      %cst_23 = arith.constant dense<0.000000e+00> : vector<8xf32>
      %36 = vector.multi_reduction <add>, %35, %cst_23 [1] : vector<8x128xf32> to vector<8xf32>
      %37 = vector.shape_cast %36 : vector<8xf32> to vector<8x1xf32>
      %c0_i32_24 = arith.constant 0 : i32
      %38 = vector.broadcast %c0_i32_24 : i32 to vector<8x1xi32>
      %39 = arith.cmpi sge, %17, %38 : vector<8x1xi32>
      %c10_i32_25 = arith.constant 10 : i32
      %40 = vector.broadcast %c10_i32_25 : i32 to vector<8x1xi32>
      %41 = arith.cmpi slt, %17, %40 : vector<8x1xi32>
      %42 = arith.andi %39, %41 : vector<8x1xi1>
      %43 = arith.extui %42 : vector<8x1xi1> to vector<8x1xi32>
      %44 = arith.sitofp %43 : vector<8x1xi32> to vector<8x1xf32>
      %45 = math.log %31 : vector<8x1xf32>
      %46 = arith.addf %26, %45 : vector<8x1xf32>
      %47 = arith.mulf %44, %46 : vector<8x1xf32>
      %48 = arith.subf %47, %37 : vector<8x1xf32>
      %cst_26 = arith.constant 5.000000e-01 : f32
      %49 = vector.broadcast %cst_26 : f32 to vector<8x128xf32>
      %50 = arith.mulf %28, %49 : vector<8x128xf32>
      %51 = math.exp %50 : vector<8x128xf32>
      %cst_27 = arith.constant dense<0.000000e+00> : vector<8xf32>
      %52 = vector.multi_reduction <add>, %51, %cst_27 [1] : vector<8x128xf32> to vector<8xf32>
      %53 = vector.shape_cast %52 : vector<8xf32> to vector<8x1xf32>
      %54 = math.log %53 : vector<8x1xf32>
      %cst_28 = arith.constant dense<0xFF800000> : vector<8xf32>
      %55 = vector.multi_reduction <maximumf>, %24, %cst_28 [1] : vector<8x128xf32> to vector<8xf32>
      %56 = vector.shape_cast %55 : vector<8xf32> to vector<8x1xf32>
      %57 = vector.broadcast %56 : vector<8x1xf32> to vector<8x128xf32>
      %58 = arith.subf %24, %57 : vector<8x128xf32>
      %cst_29 = arith.constant 5.000000e-01 : f32
      %59 = vector.broadcast %cst_29 : f32 to vector<8x128xf32>
      %60 = arith.mulf %58, %59 : vector<8x128xf32>
      %61 = math.exp %60 : vector<8x128xf32>
      %cst_30 = arith.constant dense<0.000000e+00> : vector<8xf32>
      %62 = vector.multi_reduction <add>, %61, %cst_30 [1] : vector<8x128xf32> to vector<8xf32>
      %63 = vector.shape_cast %62 : vector<8xf32> to vector<8x1xf32>
      %64 = arith.mulf %61, %50 : vector<8x128xf32>
      %cst_31 = arith.constant dense<0.000000e+00> : vector<8xf32>
      %65 = vector.multi_reduction <add>, %64, %cst_31 [1] : vector<8x128xf32> to vector<8xf32>
      %66 = vector.shape_cast %65 : vector<8xf32> to vector<8x1xf32>
      %67 = tpu.reciprocal %63 {approx = true} : vector<8x1xf32> -> vector<8x1xf32>
      %68 = arith.mulf %66, %67 : vector<8x1xf32>
      %69 = arith.subf %54, %68 : vector<8x1xf32>
      %cst_32 = arith.constant 0.699999988 : f32
      %70 = vector.broadcast %cst_32 : f32 to vector<8x1xf32>
      %71 = arith.mulf %70, %69 : vector<8x1xf32>
      %72 = arith.addf %48, %71 : vector<8x1xf32>
      %c8_i32 = arith.constant 8 : i32
      %73 = arith.muli %arg0, %c8_i32 : i32
      %74 = tpu.iota {dimensions = array<i32: 0>} : vector<8x1xi32>
      %75 = vector.broadcast %73 : i32 to vector<8x1xi32>
      %76 = arith.addi %75, %74 : vector<8x1xi32>
      %c20_i32 = arith.constant 20 : i32
      %77 = vector.broadcast %c20_i32 : i32 to vector<8x1xi32>
      %78 = arith.cmpi slt, %76, %77 : vector<8x1xi32>
      %cst_33 = arith.constant 0.000000e+00 : f32
      %79 = vector.broadcast %cst_33 : f32 to vector<8x1xf32>
      %80 = arith.select %78, %72, %79 : vector<8x1xi1>, vector<8x1xf32>
      %cst_34 = arith.constant 0.000000e+00 : f32
      %81 = vector.broadcast %cst_34 : f32 to vector<1x8x128xf32>
      %82 = vector.shape_cast %80 : vector<8x1xf32> to vector<1x8x1xf32>
      %cst_35 = arith.constant dense<0.000000e+00> : vector<1xf32>
      %83 = vector.multi_reduction <add>, %82, %cst_35 [1, 2] : vector<1x8x1xf32> to vector<1xf32>
      %84 = vector.shape_cast %83 : vector<1xf32> to vector<1x1x1xf32>
      %85 = vector.extract %84[0, 0, 0] : f32 from vector<1x1x1xf32>
      %86 = vector.broadcast %85 : f32 to vector<1x8x128xf32>
      %87 = arith.addf %81, %86 : vector<1x8x128xf32>
      %c0_36 = arith.constant 0 : index
      %c0_37 = arith.constant 0 : index
      %c0_38 = arith.constant 0 : index
      %88 = vector.load %arg7[%c0_36, %c0_37, %c0_38] : memref<1x8x128xf32, #tpu.memory_space<vmem>>, vector<1x8x128xf32>
      tpu.vector_store %arg7[%c0_36, %c0_37, %c0_38], %87 {strides = array<i32>} : memref<1x8x128xf32, #tpu.memory_space<vmem>>, vector<1x8x128xf32>,
    } else {
    }
    return
  }
  func.func @transform_0(%arg0: i32, %arg1: i32) -> (i32, i32) {
    %c0_i32 = arith.constant 0 : i32
    return %arg0, %arg1 : i32, i32
  }
  func.func @transform_1(%arg0: i32, %arg1: i32) -> (i32, i32) {
    %c0_i32 = arith.constant 0 : i32
    %c0_i32_0 = arith.constant 0 : i32
    return %arg1, %c0_i32 : i32, i32
  }
  func.func @transform_2(%arg0: i32, %arg1: i32) -> (i32, i32) {
    %c0_i32 = arith.constant 0 : i32
    %c0_i32_0 = arith.constant 0 : i32
    %c0_i32_1 = arith.constant 0 : i32
    return %c0_i32, %c0_i32_0 : i32, i32
  }
  func.func @transform_3(%arg0: i32, %arg1: i32) -> (i32, i32) {
    %c0_i32 = arith.constant 0 : i32
    %c0_i32_0 = arith.constant 0 : i32
    return %arg0, %c0_i32 : i32, i32
  }
  func.func @transform_4(%arg0: i32, %arg1: i32) -> (i32, i32) {
    %c0_i32 = arith.constant 0 : i32
    %c0_i32_0 = arith.constant 0 : i32
    return %arg0, %c0_i32 : i32, i32
  }
  func.func @transform_5(%arg0: i32, %arg1: i32) -> (i32, i32, i32) {
    %c0_i32 = arith.constant 0 : i32
    %c0_i32_0 = arith.constant 0 : i32
    %c0_i32_1 = arith.constant 0 : i32
    return %arg0, %c0_i32, %c0_i32_0 : i32, i32, i32
  }
}

</mosaic_0001>

<bundles_post_ra>
// kernel: tpu_custom_call.1
= control target key start
LH: loop header
LB: loop body
LE: loop exit
PB: predicated region body
PF: predicated region fallthrough
CT: control target
= control target key end

     0   :  { %10 = vsyncpa [#allocation4], 0  ;;  %s1121_s0 = inlined_call_operand.vmem [shape: bf16[24,32], index: 0, kind: input, shape index: {}]   ;;  %s1122_s1 = inlined_call_operand.hbm [shape: bf16[32,128], index: 1, kind: input, shape index: {}]   ;;  %s1123_s2 = inlined_call_operand.hbm [shape: f32[1,128], index: 2, kind: input, shape index: {}]   ;;  %s1124_s3 = inlined_call_operand.vmem [shape: f32[24,128], index: 3, kind: input, shape index: {}]   ;;  %s1125_s4 = inlined_call_operand.vmem [shape: s32[24,1], index: 4, kind: input, shape index: {}]   ;;  %s1126_s5 = inlined_call_operand.hbm [shape: f32[3,8,128], index: 5, kind: output, shape index: {}]  }
   0x1   :  { %11 = vsyncpa [#allocation7], 0 }
   0x2   :  { %12 = vsyncpa [#allocation5], 0 }
   0x3   :  { %14 = vsyncpa [#allocation5 + $0x1], 0  ;;  %s918_s18 = smov 0   ;;  %s920_s19 = smov 0  }
   0x4   :  { %s922_s20 = smov 0   ;;  %s924_s21 = smov 0  }
   0x5   :  { %s926_s22 = smov 0   ;;  %s928_s23 = smov 0  }
   0x6 LB: > { %s603_s24 = sadd.s32 4294967295, %s878_s23   ;;  %s604_s25 = sadd.s32 4294967294, %s878_s23   ;;  %s878_s23 = sphi %s928_s23, %s20_s23   ;;  %s874_s22 = sphi %s926_s22, %s1147_s22   ;;  %s870_s21 = sphi %s924_s21, %s1146_s21   ;;  %s866_s20 = sphi %s922_s20, %s1145_s20   ;;  %s862_s19 = sphi %s920_s19, %s1144_s19   ;;  %s858_s18 = sphi %s918_s18, %s1143_s18  }
   0x7   : > { %s32_s26 = sadd.s32 1, %s874_s22  ;;  %s166_s27 = sadd.s32 1, %s866_s20 }
   0x8   : > { %p34_p0 = scmp.ge.s32.totalorder %s32_s26, 3  ;;  %p176_p1 = scmp.ne.s32.totalorder %s866_s20, %s862_s19 }
   0x9   : > { %p177_p2 = scmp.eq.s32.totalorder %s603_s24, 2  ;;  %p182_p3 = scmp.ne.s32.totalorder %s862_s19, %s858_s18 }
   0xa   : > { %s1149_s26 = smov (%p34_p0, %s32_s26), 0  ;;  %p183_p5 = scmp.eq.s32.totalorder %s604_s25, 2 }
   0xb   : > { %1132 = sst [smem:[#allocation12_spill]] %s1149_s26  ;;  %p958_p4 = por %p177_p2, %p176_p1 }
   0xc   : > { %s163_s29 = ssub.s32 %s874_s22, %s1149_s26  ;;  %p605_p6 = scmp.ge.s32.totalorder %s878_s23, 1 }
   0xd   : > { %s1133_s28 = scalar_select %p958_p4, 1, 0 }
   0xe   : > { %p164_p7 = scmp.eq.s32.totalorder %s163_s29, 0  ;;  %p965_p8 = por %p183_p5, %p182_p3 }
   0xf   : > { %p190_p9 = scmp.lt.s32.totalorder %s878_s23, 4  ;;  %p977_p11 = scmp.eq.s32.totalorder %s603_s24, 0 }
  0x10   : > { %s1134_s30 = scalar_select %p965_p8, 1, 0 }
  0x11   : > { %s971_s6 = scalar_select %p164_p7, %s866_s20, %s166_s27  }
  0x12   : > { %p973_p10 = pnand %p605_p6, %p190_p9  ;;  %s880_s9 = smov [#allocation3]  }
  0x13   : > { %s1136_s8 = scalar_select %p977_p11, 1, 0 }
  0x14   : > { %s1135_s7 = scalar_select %p973_p10, 1, 0 }
  0x15   : > { %p649_p12 = pneg %p973_p10  ;;  %s205_s10 = sshll.u32 %s880_s9, 4  ;;  %s206_s10 = int_to_ptr.vmem [resolvable:$true] %s205_s10 }
  0x16   : > { %s881_s12 = smov [#allocation6]   ;;  %s736_s16 = scalar_lea.hbm %s1122_s1, 256 }
  0x17   : > { %p985_p13 = pnand %p977_p11, %p649_p12  ;;  %s219_s13 = sshll.u32 %s881_s12, 4  ;;  %s989_s13 = int_to_ptr.vmem [resolvable:$true] %s219_s13 }
  0x18   : > { %p737_p0 = scmp.ne.s32.totalorder %s1122_s1, %s736_s16  ;;  %p743_p5 = scmp.lt.u32.totalorder %s736_s16, %s1122_s1 }
  0x19   : > { %p738_p1 = pneg %p985_p13 }
  0x1b   : > { %p739_p2 = pnand %p738_p1, %p737_p0 }
  0x1d   : > { %p740_p3 = pneg %p739_p2 }
  0x1f   : > { %p745_p6 = pnand %p743_p5, %p740_p3 }
  0x21   : > { %748 = shalt.err (!%p745_p6)
}
  0x22   : > { %s749_s29 = scalar_lea.vmem %s206_s10, 256  ;;  %p757_p8 = scmp.lt.s32.totalorder %s206_s10, %s206_s10 }
  0x23   : > { %p750_p7 = scmp.ne.s32.totalorder %s206_s10, %s749_s29  ;;  %p758_p4 = scmp.lt.s32.totalorder %s749_s29, %s749_s29 }
  0x25   : > { %p752_p9 = pnand %p750_p7, %p738_p1  ;;  %p759_p11 = por %p758_p4, %p757_p8 }
  0x27   : > { %p753_p12 = pneg %p752_p9 }
  0x29   : > { %p760_p10 = pnand %p759_p11, %p753_p12 }
  0x2b   : > { %763 = shalt.err (!%p760_p10)
}
  0x2c   : > { %s882_s9 = smov 64   ;;  %s883_s12 = smov 4  }
  0x2d   : > { %652 = dma.hbm_to_vmem [thread:$0]  (!%p985_p13), %s1122_s1, 256, %s206_s10, [#allocation4], %s882_s9, %s882_s9, %s883_s12  }
  0x2e   : > { %s764_s24 = scalar_lea.hbm %s1123_s2, 16 }
  0x2f   : > { %p765_p0 = scmp.ne.s32.totalorder %s1123_s2, %s764_s24  ;;  %p771_p10 = scmp.lt.u32.totalorder %s764_s24, %s1123_s2 }
  0x31   : > { %p767_p4 = pnand %p765_p0, %p738_p1 }
  0x33   : > { %p768_p8 = pneg %p767_p4 }
  0x35   : > { %p773_p11 = pnand %p771_p10, %p768_p8 }
  0x37   : > { %776 = shalt.err (!%p773_p11)
}
  0x38   : > { %s777_s10 = scalar_lea.vmem %s989_s13, 16  ;;  %s784_s9 = scalar_lea.vmem %s989_s13, 32 }
  0x39   : > { %p778_p2 = scmp.ne.s32.totalorder %s989_s13, %s777_s10  ;;  %p785_p6 = scmp.lt.s32.totalorder %s989_s13, %s989_s13 }
  0x3a   : > { %p786_p7 = scmp.lt.s32.totalorder %s784_s9, %s777_s10 }
  0x3b   : > { %p780_p3 = pnand %p778_p2, %p738_p1 }
  0x3c   : > { %p787_p9 = por %p786_p7, %p785_p6 }
  0x3d   : > { %p781_p5 = pneg %p780_p3 }
  0x3f   : > { %p788_p12 = pnand %p787_p9, %p781_p5 }
  0x41   : > { %791 = shalt.err (!%p788_p12)
}
  0x42   : > { %655 = dma.hbm_to_vmem [thread:$0]  (!%p985_p13), %s1123_s2, 16, %s989_s13, [#allocation7]  }
  0x43   : > { %p1138_p0 = scmp.ne.s32.totalorder %s1135_s7, 0 }
  0x44   : > { %p1139_p1 = scmp.ne.s32.totalorder (!%p1138_p0), %s1136_s8, 0 }
  0x45   : > { %256 = sbr.rel (%p1138_p0) target bundleno = 845 (0x34d), region = 40 }
  0x4c   : > { %845 = dma.done.wait (%p1139_p1), [#allocation4], 256  }
  0x4d   : > { %847 = vsyncadd (%p1139_p1), [#allocation4], 4294967040 }
  0x4e   : > { %849 = dma.done.wait (%p1139_p1), [#allocation7], 16  }
  0x4f   : > { %851 = vsyncadd (%p1139_p1), [#allocation7], 4294967280  ;;  %p298_p4 = scmp.lt.s32.totalorder %s870_s21, 2  ;;  %v398_v0 = vlaneseq  ;;  %v884_v1 = vmov 0.0   ;;  %vm885_vm0 = vmmov 0   ;;  %v886_v2 = vmov 0  }
  0x50   : > { %629 = vmatprep.subr.bf16.mxu0 %v884_v1  ;;  %633 = vmatprep.mubr.msk.bf16.mxu0 %vm885_vm0, %v884_v1  ;;  %v722_v4 = vld [vmem:[#allocation3] sm:$0xff]   ;;  %v723_v5 = vld [vmem:[#allocation3 + $0x8] sm:$0xff]   ;;  %vm338_vm2 = vcmask 261120   ;;  %v619_v16 = vld [vmem:[#allocation6] ss:$0 sm:$0xff]  ;;  %s621_s10 = sshll.u32 %s870_s21, 3 }
  0x51   : > { %s299_s7 = scalar_select %p298_p4, %s870_s21, 2  ;;  %720 = vset.pattern.permute.xlu1 %v886_v2  ;;  %721 = vset.pattern.permute.xlu0 %v886_v2  ;;  %v399_v3 = vand.u32 127, %v398_v0  ;;  %v452_v39 = vshrl.u32 %v398_v0, 7  ;;  %v453_v41 = vstv %s621_s10  ;;  %vm457_vm8 = vcmask 7168  }
  0x52   : > { %630 = vmatpush3.bf16.msra.mxu0 %v722_v4  ;;  %s295_s9 = sand.u32 1, %s862_s19   ;;  %p1140_p8 = scmp.ne.s32.totalorder %s1133_s28, 0 }
  0x53   : > { %s614_s11 = sshll.u32 %s299_s7, 3  ;;  %s613_s13 = sshll.u32 %s299_s7, 2  ;;  %vm400_vm1 = vcmp.lt.s32.totalorder %v399_v3, 10  ;;  %631 = vmatprep.subr.bf16.mxu0 %v884_v1  ;;  %v454_v47 = vadd.s32 %v453_v41, %v452_v39 }
  0x54   : > { %s309_s15 = scalar_lea.vmem %s1124_s3, %s614_s11  ;;  %s313_s24 = scalar_lea.vmem %s1125_s4, %s614_s11 }
  0x55   : > { %v396_v6 = vld [vmem:[%s309_s15] sm:$0xff]  ;;  %s304_s29 = scalar_lea.vmem %s1121_s0, %s613_s13  ;;  %vm455_vm7 = vcmp.lt.s32.totalorder %v454_v47, 20  ;;  %s612_s26 = sshll.u32 %s295_s9, 3 }
  0x56   : > { %v397_v7 = vld [vmem:[%s313_s24] sm:$0xff]  ;;  %v401_v8 = vsel %vm400_vm1, %v396_v6, -1e+30  ;;  %632 = vmatpush3.bf16.msra.mxu0 %v723_v5  ;;  %s297_s12 = scalar_lea.vmem [#allocation8], %s612_s26  ;;  %s623_s11 = sshll.u32 %s870_s21, 7 }
  0x57   : > { %411 = vperm.xlu1 %720, %v397_v7   ;;  %403 = vmax.xlane.f32.xlu0 %v401_v8  ;;  %v321_v9 = vld [vmem:[%s304_s29] sm:$0xf]  ;;  %vm417_vm4 = vcmp.ge.s32.totalorder %v397_v7, 0  ;;  %vm418_vm5 = vcmp.lt.s32.totalorder %v397_v7, 10  ;;  %s485_s7 = sshll.u32 %s297_s12, 4  ;;  %s1076_s15 = scalar_lea.hbm %s1126_s5, %s623_s11  ;;  %s1071_s7 = int_to_ptr.vmem [resolvable:$true] %s485_s7 }
  0x58   : > { %vm419_vm6 = vmand %vm417_vm4, %vm418_vm5  ;;  %s472_s16 = scalar_lea.sflag [#allocation5], %s295_s9  ;;  %s792_s17 = scalar_lea.vmem %s1071_s7, 128 }
  0x59   : > { %634 = vmatmul.mubr.msk.bf16.vlgmr.msra.gmra.mrb[0].mxu0 %vm338_vm2, %v321_v9  ;;  %v620_v43 = vsel %vm419_vm6, 1.0, %v884_v1  ;;  %p793_p13 = scmp.ne.s32.totalorder %s1071_s7, %s792_s17  ;;  %s887_s21 = smov [#allocation8]  }
  0x5a   : > { %s796_s24 = sshll.u32 %s887_s21, 4  ;;  %s797_s24 = int_to_ptr.vmem [resolvable:$false] %s796_s24 }
  0x5b   : > { %p794_p10 = pnand %p793_p13, %p1140_p8  ;;  %s798_s25 = scalar_lea.vmem %s797_s24, 256 }
  0x5c   : > { %p799_p2 = scmp.lt.s32.totalorder %s1071_s7, %s797_s24  ;;  %p800_p3 = scmp.lt.s32.totalorder %s798_s25, %s792_s17 }
  0x5d   : > { %p795_p11 = pneg %p794_p10 }
  0x5e   : > { %p801_p5 = por %p800_p3, %p799_p2 }
  0x60   : > { %p802_p6 = pnand %p801_p5, %p795_p11 }
  0xd6   : > { %v412_v29 = vpop.permute.xlu1 %411 }
  0xd7   : > { %vm413_vm3 = vcmp.eq.s32.totalorder %v399_v3, %v412_v29 }
  0xd8   : > { %v414_v31 = vsel %vm413_vm3, %v401_v8, 0.0 }
  0xe4   : > { %v404_v10 = vpop.xlane.xlu0 %403 }
  0xe5   : > { %v405_v11 = vsub.f32 %v401_v8, %v404_v10 }
  0xe7   : > { %v406_v12 = vmul.f32 1.442695, %v405_v11  ;;  %v427_v14 = vmul.f32 0.5, %v405_v11 }
  0xe9   : > { %724 = vpow2.f32 %v406_v12  ;;  %v428_v15 = vmul.f32 1.442695, %v427_v14 }
  0xeb   : > { %726 = vpow2.f32 %v428_v15 }
  0xf3   : > { %v725_v13 = vpop.eup %724 }
  0xf4   : > { %408 = vadd.xlane.f32.xlu1 %v725_v13 }
  0xf5   : > { %v727_v23 = vpop.eup %726 }
 0x12c   : > { %v376_v17 = vpop.f32.mrb[0].mxu0 }
 0x12d   : > { %v395_v18 = vadd.f32 %v619_v16, %v376_v17  ;;  %v635_v19 = vpop.f32.mrb[1].mxu0 }
 0x12e   : > { %v379_v20 = vpop.f32.mrb[2].mxu0 }
 0x12f   : > { %v636_v21 = vpop.f32.mrb[3].mxu0  ;;  %v402_v22 = vsel %vm400_vm1, %v395_v18, -1e+30 }
 0x130   : > { %434 = vmax.xlane.f32.xlu0 %v402_v22 }
 0x134   : > { %430 = vadd.xlane.f32.xlu0 %v727_v23 }
 0x181   : > { %v409_v32 = vpop.xlane.xlu1 %408 }
 0x1bd   : > { %v435_v24 = vpop.xlane.xlu0 %434 }
 0x1be   : > { %v436_v25 = vsub.f32 %v402_v22, %v435_v24 }
 0x1c0   : > { %v437_v26 = vmul.f32 0.5, %v436_v25 }
 0x1c1   : > { %v431_v33 = vpop.xlane.xlu0 %430 }
 0x1c2   : > { %v438_v27 = vmul.f32 1.442695, %v437_v26 }
 0x1c4   : > { %728 = vpow2.f32 %v438_v27 }
 0x1c5   : > { %730 = vlog2.f32 %v409_v32 }
 0x1c6   : > { %732 = vlog2.f32 %v431_v33 }
 0x1ce   : > { %v729_v28 = vpop.eup %728 }
 0x1cf   : > { %440 = vadd.xlane.f32.xlu0 %v729_v28  ;;  %v442_v30 = vmul.f32 %v729_v28, %v427_v14  ;;  %v731_v35 = vpop.eup %730 }
 0x1d0   : > { %v423_v36 = vmul.f32 0.6931472, %v731_v35  ;;  %v733_v38 = vpop.eup %732 }
 0x1d1   : > { %v433_v44 = vmul.f32 0.6931472, %v733_v38 }
 0x1d2   : > { %v424_v40 = vadd.f32 %v423_v36, %v404_v10 }
 0x1d3   : > { %443 = vadd.xlane.f32.xlu0 %v442_v30 }
 0x1d4   : > { %v425_v49 = vmul.f32 %v620_v43, %v424_v40 }
 0x1d7   : > { %415 = vadd.xlane.f32.xlu0 %v414_v31 }
 0x25c   : > { %v441_v34 = vpop.xlane.xlu0 %440 }
 0x25d   : > { %734 = vrcp.f32 %v441_v34 }
 0x260   : > { %v444_v37 = vpop.xlane.xlu0 %443 }
 0x264   : > { %v416_v46 = vpop.xlane.xlu0 %415 }
 0x265   : > { %v426_v51 = vsub.f32 %v425_v49, %v416_v46 }
 0x267   : > { %v735_v42 = vpop.eup %734 }
 0x268   : > { %v446_v45 = vmul.f32 %v735_v42, %v444_v37 }
 0x26a   : > { %v447_v48 = vsub.f32 %v433_v44, %v446_v45 }
 0x26c   : > { %v448_v50 = vmul.f32 0.7, %v447_v48 }
 0x26e   : > { %v449_v52 = vadd.f32 %v448_v50, %v426_v51 }
 0x270   : > { %v456_v53 = vsel %vm455_vm7, %v449_v52, 0.0 }
 0x271   : > { %v458_v54 = vsel %vm457_vm8, %v456_v53, 0.0 }
 0x272   : > { %459 = vadd.xlane.f32.xlu0 %v458_v54 }
 0x2ff   : > { %v460_v55 = vpop.xlane.xlu0 %459 }
 0x300   : > { %v461_v56 = vrot.slane %v460_v55, 4 }
 0x302   : > { %v462_v57 = vadd.f32 %v461_v56, %v460_v55 }
 0x304   : > { %v463_v58 = vrot.slane %v462_v57, 2 }
 0x306   : > { %v464_v59 = vadd.f32 %v463_v58, %v462_v57 }
 0x308   : > { %v465_v60 = vrot.slane %v464_v59, 1 }
 0x30a   : > { %v466_v61 = vadd.f32 %v465_v60, %v464_v59 }
 0x30c   : > { %637 = vpush %v466_v61 }
 0x33d   : > { %s638_s13 = spop %637 }
 0x33e   : > { %v468_v62 = vstv %s638_s13 }
 0x33f   : > { %470 = vst [vmem:[%s297_s12] sm:$0xff] %v468_v62 }
 0x340   : > { %805 = shalt.err (!%p802_p6)
}
 0x341   : > { %s806_s27 = scalar_lea.hbm %s1076_s15, 128  ;;  %s810_s9 = scalar_lea.hbm %s1126_s5, 384 }
 0x342   : > { %p807_p7 = scmp.ne.s32.totalorder %s1076_s15, %s806_s27  ;;  %p811_p0 = scmp.lt.u32.totalorder %s1076_s15, %s1126_s5 }
 0x343   : > { %p812_p1 = scmp.lt.u32.totalorder %s810_s9, %s806_s27  ;;  %p814_p13 = scmp.lt.u32.totalorder %s806_s27, %s1076_s15 }
 0x344   : > { %p808_p9 = pnand %p807_p7, %p1140_p8 }
 0x345   : > { %p813_p4 = por %p812_p1, %p811_p0 }
 0x346   : > { %p809_p12 = pneg %p808_p9 }
 0x347   : > { %p815_p10 = por %p814_p13, %p813_p4 }
 0x349   : > { %p816_p11 = pnand %p815_p10, %p809_p12 }
 0x34b   : > { %819 = shalt.err (!%p816_p11)
}
 0x34c   : > { %647 = dma.vmem_to_hbm [thread:$0]  (%p1140_p8), %s1071_s7, 128, %s1076_s15, %s472_s16  }
 0x34d PF: > { %p664_p2 = scmp.ge.s32.totalorder %s878_s23, 2  ;;  %s497_s11 = sand.u32 1, %s858_s18  }
 0x34e   : > { %p1141_p3 = scmp.ne.s32.totalorder %s1134_s30, 0  ;;  %s498_s13 = scalar_lea.sflag [#allocation5], %s497_s11 }
 0x350   : > { %p657_p5 = pnand %p664_p2, %p1141_p3 }
 0x352   : > { %853 = dma.done.wait (!%p657_p5), %s498_s13, 128  }
 0x353   : > { %855 = vsyncadd (!%p657_p5), %s498_s13, 4294967168  ;;  %s20_s23 = sadd.s32 1, %s878_s23   ;;  %s1142_s28 = sld [smem:[#allocation12_spill]] }
 0x354   : > { %p17_p6 = scmp.ge.s32.totalorder %s20_s23, 5   ;;  %s1143_s18 = smov %s862_s19 }
 0x355   : > { %s1144_s19 = smov %s866_s20  ;;  %s1145_s20 = smov %s971_s6 }
 0x356   : > { %s1146_s21 = smov %s874_s22  ;;  %19 = sbr.rel (!%p17_p6) target bundleno = 6 (0x6), region = 99 }
 0x359   : > { %s1147_s22 = smov %s1142_s28 }
 0x35d   :  { %503 = vsyncpa [#allocation4], 1 }
 0x35e   :  { %505 = vsyncpa [#allocation4 + $0x1], 1 }
 0x35f   :  { %506 = vsyncpa [#allocation7], 1 }
 0x360   :  { %507 = vsyncpa [#allocation5], 1 }
 0x361   :  { %509 = vsyncpa [#allocation5 + $0x1], 1 }

</bundles_post_ra>
